<compile_context>
chip_gen: v6e
topology: v6e:2x2x1
jax: 0.10.0
libtpu: 0.0.40
codegen_flags: <defaults>
</compile_context>

<pallas_src>
import functools

import jax
import jax.numpy as jnp
from jax import lax
from jax.experimental import pallas as pl
from jax.experimental.pallas import tpu as pltpu


def _dotgat_layer_kernel(x_ref, w_ref, adj_ref, o_ref, feat_ref, *, num_heads):
    """One DotGatConv layer (all heads fused), one destination-row tile per step.

    x_ref    : (N, F_in)     node features (resident, constant index map)
    w_ref    : (F_in, H*D)   fused projection; columns [h*D:(h+1)*D] == W_h
    adj_ref  : (TILE, N)     int8 adj[dst, src] tile (1 iff edge src->dst)
    o_ref    : (TILE, H*D)   layer output tile (already head-flattened)
    feat_ref : (N, H*D)      bf16 VMEM scratch: projected features, all heads
    """
    i = pl.program_id(0)
    tile, hd = o_ref.shape
    d = hd // num_heads
    scale = jnp.float32(1.0 / float(d) ** 0.5)

    # Project all heads at once, only on the first grid step; the scratch
    # stays resident and is reused by every destination-row tile.
    @pl.when(i == 0)
    def _():
        feat_ref[...] = jnp.dot(
            x_ref[...], w_ref[...],
            preferred_element_type=jnp.float32).astype(feat_ref.dtype)

    feat_all = feat_ref[...]                                  # (N, H*D) bf16
    row0 = pl.multiple_of(i * tile, tile)
    feat_dst = feat_ref[pl.ds(row0, tile), :]                 # (TILE, H*D) bf16

    # Additive softmax mask, computed once per tile and shared by all heads.
    # Graph is assumed to carry self-loops (as in the reference usage), so no
    # destination row is fully masked.
    adj = adj_ref[...].astype(jnp.float32)                    # (TILE, N)
    bias = jnp.where(adj > 0.5, jnp.float32(0.0), jnp.float32(-1e30))

    outs = []
    for h in range(num_heads):
        f_all = feat_all[:, h * d:(h + 1) * d]                # (N, D) bf16
        f_dst = feat_dst[:, h * d:(h + 1) * d]                # (TILE, D) bf16

        # scores[v, u] = <feat_v, feat_u> / sqrt(D); contract dim 1 of both
        # operands so the MXU consumes the transposed operand directly.
        scores = lax.dot_general(
            f_dst, f_all,
            dimension_numbers=(((1,), (1,)), ((), ())),
            preferred_element_type=jnp.float32)               # (TILE, N) f32

        logits = scores * scale + bias                        # masked, f32
        m = jnp.max(logits, axis=-1, keepdims=True)
        p = jnp.exp(logits - m)                               # 0 on non-edges
        denom = jnp.sum(p, axis=-1, keepdims=True)
        attn = p * pl.reciprocal(denom, approx=True)          # EUP, not VALU

        outs.append(jnp.dot(attn.astype(feat_all.dtype), f_all,
                            preferred_element_type=jnp.float32))  # (TILE, D)

    # Single lane-dense store of the head-flattened tile (torch .flatten(1)).
    o_ref[...] = jnp.concatenate(outs, axis=-1).astype(o_ref.dtype)


def _pick_dst_tile(n):
    """Destination-row tile: whole graph when small, else a 128-multiple divisor."""
    if n <= 512:
        return n
    for t in (512, 384, 256, 128):
        if n % t == 0:
            return t
    return n


def dotgat_layer(x, w_flat, adj_i8, num_heads):
    """One fused DotGatConv layer; returns (N, H*D) directly."""
    N, F_in = x.shape
    F_w, HD = w_flat.shape
    assert F_w == F_in and HD % num_heads == 0
    tile = _pick_dst_tile(N)
    grid = (N // tile,)

    kernel = functools.partial(_dotgat_layer_kernel, num_heads=num_heads)
    return pl.pallas_call(
        kernel,
        out_shape=jax.ShapeDtypeStruct((N, HD), jnp.float32),
        grid_spec=pltpu.PrefetchScalarGridSpec(
            num_scalar_prefetch=0,
            grid=grid,
            in_specs=[
                pl.BlockSpec((N, F_in), lambda i: (0, 0)),    # resident
                pl.BlockSpec((F_in, HD), lambda i: (0, 0)),   # resident
                pl.BlockSpec((tile, N), lambda i: (i, 0)),    # streamed per tile
            ],
            out_specs=pl.BlockSpec((tile, HD), lambda i: (i, 0)),
            scratch_shapes=[pltpu.VMEM((N, HD), jnp.bfloat16)],
        ),
        # "arbitrary": the feat scratch is filled under pl.when(i == 0) and
        # reused by all later tiles, so the dst axis cannot be core-sharded.
        compiler_params=pltpu.CompilerParams(
            dimension_semantics=("arbitrary",)),
    )(x, w_flat, adj_i8)


def graph_gat_forward(adj, features, weights, num_heads, activation=jax.nn.relu):
    """GraphGAT.forward: adj[u, v] == 1 iff directed edge u -> v."""
    adj_ds = (adj.T > 0).astype(jnp.int8)   # reindex to [dst, src], int8
    h = features
    for i, w_flat in enumerate(weights):
        if i != 0:
            h = activation(h)
        # dropout: identity (eval mode)
        h = dotgat_layer(h, w_flat, adj_ds, num_heads)
    return h


def init_weights(key, n_layers, in_feats, n_hidden, num_heads):
    """Init matching nn.Linear(in_feats, n_hidden*num_heads, bias=False),
    stored directly in the fused (F_in, H*D) layout the kernel consumes."""
    weights = []
    bound = 1.0 / jnp.sqrt(jnp.float32(in_feats))
    for _ in range(n_layers):
        key, sub = jax.random.split(key)
        w = jax.random.uniform(
            sub, (in_feats, n_hidden * num_heads),
            minval=-bound, maxval=bound, dtype=jnp.float32)
        weights.append(w)
    return weights


if __name__ == "__main__":
    # Small shapes: so that the layer output (num_heads*n_hidden) feeds the
    # next layer (which expects in_feats), pick in_feats == num_heads*n_hidden.
    N = 16          # nodes
    in_feats = 32
    n_hidden = 8
    num_heads = 4
    n_layers = 2
    assert in_feats == num_heads * n_hidden

    key = jax.random.PRNGKey(0)
    kx, kw = jax.random.split(key)

    features = jax.random.normal(kx, (N, in_feats), dtype=jnp.float32)

    # Deterministic graph: directed ring + reverse ring + self-loops.
    adj = jnp.zeros((N, N), dtype=jnp.float32)
    idx = jnp.arange(N)
    adj = adj.at[idx, (idx + 1) % N].set(1.0)   # u -> u+1
    adj = adj.at[(idx + 1) % N, idx].set(1.0)   # u+1 -> u
    adj = adj.at[idx, idx].set(1.0)             # self-loops

    weights = init_weights(kw, n_layers, in_feats, n_hidden, num_heads)

    out = graph_gat_forward(adj, features, weights, num_heads,
                            activation=jax.nn.relu)
    out = jax.block_until_ready(out)

    assert out.shape == (N, num_heads * n_hidden), out.shape
    assert bool(jnp.all(jnp.isfinite(out)))
    print("KERNEL_OK")
</pallas_src>

<mosaic_0001>
module attributes {stable_mosaic.version = 11 : i64} {
  func.func @_dotgat_layer_kernel(%arg0: i32, %arg1: memref<16x32xf32, #tpu.memory_space<vmem>>, %arg2: memref<32x32xf32, #tpu.memory_space<vmem>>, %arg3: memref<16x16xi8, #tpu.memory_space<vmem>>, %arg4: memref<16x32xf32, #tpu.memory_space<vmem>>, %arg5: memref<16x32xbf16, #tpu.memory_space<vmem>>) attributes {dimension_semantics = [#tpu.dimension_semantics<arbitrary>], iteration_bounds = array<i64: 1>, scalar_prefetch = 0 : i64, scratch_operands = 1 : i64, tpu.core_type = #tpu.core_type<tc>, window_params = [{pipeline_mode = #tpu.pipeline_mode<synchronous>, transform_indices = @transform_0, window_bounds = array<i64: 16, 32>}, {pipeline_mode = #tpu.pipeline_mode<synchronous>, transform_indices = @transform_1, window_bounds = array<i64: 32, 32>}, {transform_indices = @transform_2, window_bounds = array<i64: 16, 16>}, {transform_indices = @transform_3, window_bounds = array<i64: 16, 32>}]} {
    %c0_i32 = arith.constant 0 : i32
    %0 = arith.cmpi eq, %arg0, %c0_i32 : i32
    %1 = arith.extui %0 : i1 to i32
    %c0_i32_0 = arith.constant 0 : i32
    %2 = arith.cmpi ne, %1, %c0_i32_0 : i32
    scf.if %2 {
      %c0_29 = arith.constant 0 : index
      %c0_30 = arith.constant 0 : index
      %89 = vector.load %arg1[%c0_29, %c0_30] : memref<16x32xf32, #tpu.memory_space<vmem>>, vector<16x32xf32>
      %c0_31 = arith.constant 0 : index
      %c0_32 = arith.constant 0 : index
      %90 = vector.load %arg2[%c0_31, %c0_32] : memref<32x32xf32, #tpu.memory_space<vmem>>, vector<32x32xf32>
      %cst_33 = arith.constant dense<0.000000e+00> : vector<16x32xf32>
      %91 = tpu.matmul %89, %90, %cst_33 {dimension_numbers = #tpu.dot_dimension_numbers<[1], [0], [0], [1], [0, 0, 1, 1], [], []>} : vector<16x32xf32>, vector<32x32xf32>, vector<16x32xf32> -> vector<16x32xf32>
      %92 = arith.truncf %91 : vector<16x32xf32> to vector<16x32xbf16>
      %c0_34 = arith.constant 0 : index
      %c0_35 = arith.constant 0 : index
      %93 = vector.load %arg5[%c0_34, %c0_35] : memref<16x32xbf16, #tpu.memory_space<vmem>>, vector<16x32xbf16>
      tpu.vector_store %arg5[%c0_34, %c0_35], %92 {strides = array<i32>} : memref<16x32xbf16, #tpu.memory_space<vmem>>, vector<16x32xbf16>,
    } else {
    }
    %c0 = arith.constant 0 : index
    %c0_1 = arith.constant 0 : index
    %3 = vector.load %arg5[%c0, %c0_1] : memref<16x32xbf16, #tpu.memory_space<vmem>>, vector<16x32xbf16>
    %c16_i32 = arith.constant 16 : i32
    %4 = arith.muli %arg0, %c16_i32 : i32
    %5 = tpu.assume_multiple %4, 16 : i32
    %6 = arith.index_cast %5 : i32 to index
    %c0_2 = arith.constant 0 : index
    %7 = vector.load %arg5[%6, %c0_2] : memref<16x32xbf16, #tpu.memory_space<vmem>>, vector<16x32xbf16>
    %c0_3 = arith.constant 0 : index
    %c0_4 = arith.constant 0 : index
    %8 = vector.load %arg3[%c0_3, %c0_4] : memref<16x16xi8, #tpu.memory_space<vmem>>, vector<16x16xi8>
    %9 = arith.sitofp %8 : vector<16x16xi8> to vector<16x16xf32>
    %cst = arith.constant 5.000000e-01 : f32
    %10 = vector.broadcast %cst : f32 to vector<16x16xf32>
    %11 = arith.cmpf ogt, %9, %10 : vector<16x16xf32>
    %cst_5 = arith.constant 0.000000e+00 : f32
    %cst_6 = arith.constant -1.000000e+30 : f32
    %12 = vector.broadcast %cst_5 : f32 to vector<16x16xf32>
    %13 = vector.broadcast %cst_6 : f32 to vector<16x16xf32>
    %14 = arith.select %11, %12, %13 : vector<16x16xi1>, vector<16x16xf32>
    %15 = vector.extract_strided_slice %3 {offsets = [0, 0], sizes = [16, 8], strides = [1, 1]} : vector<16x32xbf16> to vector<16x8xbf16>
    %16 = vector.extract_strided_slice %7 {offsets = [0, 0], sizes = [16, 8], strides = [1, 1]} : vector<16x32xbf16> to vector<16x8xbf16>
    %cst_7 = arith.constant dense<0.000000e+00> : vector<16x16xf32>
    %17 = tpu.matmul %16, %15, %cst_7 {dimension_numbers = #tpu.dot_dimension_numbers<[1], [1], [0], [0], [0, 0, 1, 0], [], []>} : vector<16x8xbf16>, vector<16x8xbf16>, vector<16x16xf32> -> vector<16x16xf32>
    %cst_8 = arith.constant 0.353553385 : f32
    %18 = vector.broadcast %cst_8 : f32 to vector<16x16xf32>
    %19 = arith.mulf %17, %18 : vector<16x16xf32>
    %20 = arith.addf %19, %14 : vector<16x16xf32>
    %cst_9 = arith.constant dense<0xFF800000> : vector<16xf32>
    %21 = vector.multi_reduction <maximumf>, %20, %cst_9 [1] : vector<16x16xf32> to vector<16xf32>
    %22 = vector.shape_cast %21 : vector<16xf32> to vector<16x1xf32>
    %23 = vector.broadcast %22 : vector<16x1xf32> to vector<16x16xf32>
    %24 = arith.subf %20, %23 : vector<16x16xf32>
    %25 = math.exp %24 : vector<16x16xf32>
    %cst_10 = arith.constant dense<0.000000e+00> : vector<16xf32>
    %26 = vector.multi_reduction <add>, %25, %cst_10 [1] : vector<16x16xf32> to vector<16xf32>
    %27 = vector.shape_cast %26 : vector<16xf32> to vector<16x1xf32>
    %28 = tpu.reciprocal %27 {approx = true} : vector<16x1xf32> -> vector<16x1xf32>
    %29 = vector.broadcast %28 : vector<16x1xf32> to vector<16x16xf32>
    %30 = arith.mulf %25, %29 : vector<16x16xf32>
    %31 = arith.truncf %30 : vector<16x16xf32> to vector<16x16xbf16>
    %cst_11 = arith.constant dense<0.000000e+00> : vector<16x8xf32>
    %32 = tpu.matmul %31, %15, %cst_11 {dimension_numbers = #tpu.dot_dimension_numbers<[1], [0], [0], [1], [0, 0, 1, 1], [], []>} : vector<16x16xbf16>, vector<16x8xbf16>, vector<16x8xf32> -> vector<16x8xf32>
    %33 = vector.extract_strided_slice %3 {offsets = [0, 8], sizes = [16, 8], strides = [1, 1]} : vector<16x32xbf16> to vector<16x8xbf16>
    %34 = vector.extract_strided_slice %7 {offsets = [0, 8], sizes = [16, 8], strides = [1, 1]} : vector<16x32xbf16> to vector<16x8xbf16>
    %cst_12 = arith.constant dense<0.000000e+00> : vector<16x16xf32>
    %35 = tpu.matmul %34, %33, %cst_12 {dimension_numbers = #tpu.dot_dimension_numbers<[1], [1], [0], [0], [0, 0, 1, 0], [], []>} : vector<16x8xbf16>, vector<16x8xbf16>, vector<16x16xf32> -> vector<16x16xf32>
    %cst_13 = arith.constant 0.353553385 : f32
    %36 = vector.broadcast %cst_13 : f32 to vector<16x16xf32>
    %37 = arith.mulf %35, %36 : vector<16x16xf32>
    %38 = arith.addf %37, %14 : vector<16x16xf32>
    %cst_14 = arith.constant dense<0xFF800000> : vector<16xf32>
    %39 = vector.multi_reduction <maximumf>, %38, %cst_14 [1] : vector<16x16xf32> to vector<16xf32>
    %40 = vector.shape_cast %39 : vector<16xf32> to vector<16x1xf32>
    %41 = vector.broadcast %40 : vector<16x1xf32> to vector<16x16xf32>
    %42 = arith.subf %38, %41 : vector<16x16xf32>
    %43 = math.exp %42 : vector<16x16xf32>
    %cst_15 = arith.constant dense<0.000000e+00> : vector<16xf32>
    %44 = vector.multi_reduction <add>, %43, %cst_15 [1] : vector<16x16xf32> to vector<16xf32>
    %45 = vector.shape_cast %44 : vector<16xf32> to vector<16x1xf32>
    %46 = tpu.reciprocal %45 {approx = true} : vector<16x1xf32> -> vector<16x1xf32>
    %47 = vector.broadcast %46 : vector<16x1xf32> to vector<16x16xf32>
    %48 = arith.mulf %43, %47 : vector<16x16xf32>
    %49 = arith.truncf %48 : vector<16x16xf32> to vector<16x16xbf16>
    %cst_16 = arith.constant dense<0.000000e+00> : vector<16x8xf32>
    %50 = tpu.matmul %49, %33, %cst_16 {dimension_numbers = #tpu.dot_dimension_numbers<[1], [0], [0], [1], [0, 0, 1, 1], [], []>} : vector<16x16xbf16>, vector<16x8xbf16>, vector<16x8xf32> -> vector<16x8xf32>
    %51 = vector.extract_strided_slice %3 {offsets = [0, 16], sizes = [16, 8], strides = [1, 1]} : vector<16x32xbf16> to vector<16x8xbf16>
    %52 = vector.extract_strided_slice %7 {offsets = [0, 16], sizes = [16, 8], strides = [1, 1]} : vector<16x32xbf16> to vector<16x8xbf16>
    %cst_17 = arith.constant dense<0.000000e+00> : vector<16x16xf32>
    %53 = tpu.matmul %52, %51, %cst_17 {dimension_numbers = #tpu.dot_dimension_numbers<[1], [1], [0], [0], [0, 0, 1, 0], [], []>} : vector<16x8xbf16>, vector<16x8xbf16>, vector<16x16xf32> -> vector<16x16xf32>
    %cst_18 = arith.constant 0.353553385 : f32
    %54 = vector.broadcast %cst_18 : f32 to vector<16x16xf32>
    %55 = arith.mulf %53, %54 : vector<16x16xf32>
    %56 = arith.addf %55, %14 : vector<16x16xf32>
    %cst_19 = arith.constant dense<0xFF800000> : vector<16xf32>
    %57 = vector.multi_reduction <maximumf>, %56, %cst_19 [1] : vector<16x16xf32> to vector<16xf32>
    %58 = vector.shape_cast %57 : vector<16xf32> to vector<16x1xf32>
    %59 = vector.broadcast %58 : vector<16x1xf32> to vector<16x16xf32>
    %60 = arith.subf %56, %59 : vector<16x16xf32>
    %61 = math.exp %60 : vector<16x16xf32>
    %cst_20 = arith.constant dense<0.000000e+00> : vector<16xf32>
    %62 = vector.multi_reduction <add>, %61, %cst_20 [1] : vector<16x16xf32> to vector<16xf32>
    %63 = vector.shape_cast %62 : vector<16xf32> to vector<16x1xf32>
    %64 = tpu.reciprocal %63 {approx = true} : vector<16x1xf32> -> vector<16x1xf32>
    %65 = vector.broadcast %64 : vector<16x1xf32> to vector<16x16xf32>
    %66 = arith.mulf %61, %65 : vector<16x16xf32>
    %67 = arith.truncf %66 : vector<16x16xf32> to vector<16x16xbf16>
    %cst_21 = arith.constant dense<0.000000e+00> : vector<16x8xf32>
    %68 = tpu.matmul %67, %51, %cst_21 {dimension_numbers = #tpu.dot_dimension_numbers<[1], [0], [0], [1], [0, 0, 1, 1], [], []>} : vector<16x16xbf16>, vector<16x8xbf16>, vector<16x8xf32> -> vector<16x8xf32>
    %69 = vector.extract_strided_slice %3 {offsets = [0, 24], sizes = [16, 8], strides = [1, 1]} : vector<16x32xbf16> to vector<16x8xbf16>
    %70 = vector.extract_strided_slice %7 {offsets = [0, 24], sizes = [16, 8], strides = [1, 1]} : vector<16x32xbf16> to vector<16x8xbf16>
    %cst_22 = arith.constant dense<0.000000e+00> : vector<16x16xf32>
    %71 = tpu.matmul %70, %69, %cst_22 {dimension_numbers = #tpu.dot_dimension_numbers<[1], [1], [0], [0], [0, 0, 1, 0], [], []>} : vector<16x8xbf16>, vector<16x8xbf16>, vector<16x16xf32> -> vector<16x16xf32>
    %cst_23 = arith.constant 0.353553385 : f32
    %72 = vector.broadcast %cst_23 : f32 to vector<16x16xf32>
    %73 = arith.mulf %71, %72 : vector<16x16xf32>
    %74 = arith.addf %73, %14 : vector<16x16xf32>
    %cst_24 = arith.constant dense<0xFF800000> : vector<16xf32>
    %75 = vector.multi_reduction <maximumf>, %74, %cst_24 [1] : vector<16x16xf32> to vector<16xf32>
    %76 = vector.shape_cast %75 : vector<16xf32> to vector<16x1xf32>
    %77 = vector.broadcast %76 : vector<16x1xf32> to vector<16x16xf32>
    %78 = arith.subf %74, %77 : vector<16x16xf32>
    %79 = math.exp %78 : vector<16x16xf32>
    %cst_25 = arith.constant dense<0.000000e+00> : vector<16xf32>
    %80 = vector.multi_reduction <add>, %79, %cst_25 [1] : vector<16x16xf32> to vector<16xf32>
    %81 = vector.shape_cast %80 : vector<16xf32> to vector<16x1xf32>
    %82 = tpu.reciprocal %81 {approx = true} : vector<16x1xf32> -> vector<16x1xf32>
    %83 = vector.broadcast %82 : vector<16x1xf32> to vector<16x16xf32>
    %84 = arith.mulf %79, %83 : vector<16x16xf32>
    %85 = arith.truncf %84 : vector<16x16xf32> to vector<16x16xbf16>
    %cst_26 = arith.constant dense<0.000000e+00> : vector<16x8xf32>
    %86 = tpu.matmul %85, %69, %cst_26 {dimension_numbers = #tpu.dot_dimension_numbers<[1], [0], [0], [1], [0, 0, 1, 1], [], []>} : vector<16x16xbf16>, vector<16x8xbf16>, vector<16x8xf32> -> vector<16x8xf32>
    %87 = tpu.concatenate %32, %50, %68, %86 in 1 : vector<16x8xf32>, vector<16x8xf32>, vector<16x8xf32>, vector<16x8xf32> -> vector<16x32xf32>
    %c0_27 = arith.constant 0 : index
    %c0_28 = arith.constant 0 : index
    %88 = vector.load %arg4[%c0_27, %c0_28] : memref<16x32xf32, #tpu.memory_space<vmem>>, vector<16x32xf32>
    tpu.vector_store %arg4[%c0_27, %c0_28], %87 {strides = array<i32>} : memref<16x32xf32, #tpu.memory_space<vmem>>, vector<16x32xf32>,
    return
  }
  func.func @transform_0(%arg0: i32) -> (i32, i32) {
    %c0_i32 = arith.constant 0 : i32
    %c0_i32_0 = arith.constant 0 : i32
    %c0_i32_1 = arith.constant 0 : i32
    return %c0_i32, %c0_i32_0 : i32, i32
  }
  func.func @transform_1(%arg0: i32) -> (i32, i32) {
    %c0_i32 = arith.constant 0 : i32
    %c0_i32_0 = arith.constant 0 : i32
    %c0_i32_1 = arith.constant 0 : i32
    return %c0_i32, %c0_i32_0 : i32, i32
  }
  func.func @transform_2(%arg0: i32) -> (i32, i32) {
    %c0_i32 = arith.constant 0 : i32
    %c0_i32_0 = arith.constant 0 : i32
    return %arg0, %c0_i32 : i32, i32
  }
  func.func @transform_3(%arg0: i32) -> (i32, i32) {
    %c0_i32 = arith.constant 0 : i32
    %c0_i32_0 = arith.constant 0 : i32
    return %arg0, %c0_i32 : i32, i32
  }
}

</mosaic_0001>

<bundles_post_ra>
// kernel: tpu_custom_call.1
= control target key start
LH: loop header
LB: loop body
LE: loop exit
PB: predicated region body
PF: predicated region fallthrough
CT: control target
= control target key end

     0   :  { %8 = vsyncpa [#allocation4], 0  ;;  %s1101_s0 = inlined_call_operand.hbm [shape: f32[16,32], index: 0, kind: input, shape index: {}]   ;;  %s1102_s1 = inlined_call_operand.hbm [shape: f32[32,32], index: 1, kind: input, shape index: {}]   ;;  %s1103_s2 = inlined_call_operand.hbm [shape: s8[16,16], index: 2, kind: input, shape index: {}]   ;;  %s1104_s3 = inlined_call_operand.hbm [shape: f32[16,32], index: 3, kind: output, shape index: {}]  }
   0x1   :  { %9 = vsyncpa [#allocation7], 0 }
   0x2   :  { %10 = vsyncpa [#allocation5], 0  ;;  %s970_s12 = smov [#allocation6]   ;;  %s971_s14 = smov [#allocation3]  }
   0x3   :  { %s28_s13 = sshll.u32 %s970_s12, 4  ;;  %s16_s15 = sshll.u32 %s971_s14, 4  ;;  %s29_s13 = int_to_ptr.vmem [resolvable:$true] %s28_s13  ;;  %s17_s15 = int_to_ptr.vmem [resolvable:$true] %s16_s15 }
   0x4   :  { %s892_s16 = scalar_lea.vmem %s29_s13, 512  ;;  %p897_p1 = scmp.lt.s32.totalorder %s29_s13, %s29_s13 }
   0x5   :  { %p893_p0 = scmp.ne.s32.totalorder %s29_s13, %s892_s16  ;;  %p898_p2 = scmp.lt.s32.totalorder %s892_s16, %s892_s16 }
   0x7   :  { %p899_p3 = por %p898_p2, %p897_p1 }
   0x9   :  { %p900_p4 = pnand %p899_p3, %p893_p0 }
   0xb   :  { %903 = shalt.err (!%p900_p4)
}
   0xc   :  { %s972_s17 = smov 128   ;;  %s973_s18 = smov 8  }
   0xd   :  { %34 = dma.hbm_to_vmem [thread:$0]  %s1102_s1, 512, %s29_s13, [#allocation7], %s972_s17, %s972_s17, %s973_s18  }
   0xe   :  { %s912_s21 = scalar_lea.vmem %s17_s15, 256  ;;  %p917_p6 = scmp.lt.s32.totalorder %s17_s15, %s17_s15 }
   0xf   :  { %p913_p5 = scmp.ne.s32.totalorder %s17_s15, %s912_s21  ;;  %p918_p7 = scmp.lt.s32.totalorder %s912_s21, %s912_s21 }
  0x11   :  { %p919_p8 = por %p918_p7, %p917_p6 }
  0x13   :  { %p920_p9 = pnand %p919_p8, %p913_p5 }
  0x15   :  { %923 = shalt.err (!%p920_p9)
}
  0x16   :  { %22 = dma.hbm_to_vmem [thread:$0]  %s1101_s0, 256, %s17_s15, [#allocation4], %s972_s17, %s972_s17, %s973_s18  }
  0x17   :  { %s974_s24 = smov [#allocation8]  }
  0x18   :  { %s40_s25 = sshll.u32 %s974_s24, 4  ;;  %s41_s25 = int_to_ptr.vmem [resolvable:$true] %s40_s25 }
  0x19   :  { %s932_s26 = scalar_lea.vmem %s41_s25, 64  ;;  %p937_p11 = scmp.lt.s32.totalorder %s41_s25, %s41_s25 }
  0x1a   :  { %p933_p10 = scmp.ne.s32.totalorder %s41_s25, %s932_s26  ;;  %p938_p12 = scmp.lt.s32.totalorder %s932_s26, %s932_s26 }
  0x1c   :  { %p939_p13 = por %p938_p12, %p937_p11 }
  0x1e   :  { %p940_p0 = pnand %p939_p13, %p933_p10 }
  0x20   :  { %943 = shalt.err (!%p940_p0)
}
  0x21   :  { %s975_s1 = smov 32   ;;  %s976_s27 = smov 2  }
  0x22   :  { %46 = dma.hbm_to_vmem [thread:$0]  %s1103_s2, 64, %s41_s25, [#allocation7], %s975_s1, %s975_s1, %s976_s27  }
  0x23   :  { %964 = dma.done.wait [#allocation4], 256  }
  0x24   :  { %965 = vsyncadd [#allocation4], 4294967040 }
  0x25   :  { %966 = dma.done.wait [#allocation7], 576  }
  0x26   :  { %967 = vsyncadd [#allocation7], 4294966720  ;;  %vm67_vm0 = vcmask 261120   ;;  %v66_v0 = vld [vmem:[#allocation6 + $0x18] sm:$0xff]  ;;  %v65_v1 = vld [vmem:[#allocation6 + $0x10] sm:$0xff]  ;;  %v977_v6 = vmov 0.0  }
  0x27   :  { %775 = vmatprep.subr.mxu0 %v66_v0  ;;  %v61_v2 = vld [vmem:[#allocation3] sm:$0xff]  ;;  %v64_v3 = vld [vmem:[#allocation6 + $0x8] sm:$0xff]  ;;  %v63_v4 = vld [vmem:[#allocation6] sm:$0xff]  ;;  %786 = vmatprep.subr.bf16.mxu1 %v977_v6  ;;  %vm978_vm1 = vmmov 0   ;;  %vm157_vm2 = vcmask 257024   ;;  %vm189_vm3 = vcmask 64512  }
  0x28   :  { %776 = vmatpush3.msra.mxu0 %v66_v0  ;;  %783 = vmatprep.mubr.msk.f32.mxu0 %vm67_vm0, %v61_v2  ;;  %v62_v5 = vld [vmem:[#allocation3 + $0x8] sm:$0xff]  ;;  %s979_s0 = smov 112   ;;  %s980_s2 = smov 120   ;;  %v750_v23 = vld [vmem:[#allocation8] sm:$0xf]   ;;  %vm241_vm6 = vcmask 130048  }
  0x29   :  { %777 = vmatprep.subr.mxu0 %v65_v1  ;;  %788 = vmatprep.mubr.msk.bf16.mxu1 %vm978_vm1, %v977_v6  ;;  %s981_s30 = smov 104   ;;  %v751_v24 = vunpack.c.0.s8 %v750_v23  ;;  %v752_v26 = vunpack.c.1.s8 %v750_v23  ;;  %v982_v29 = vmov -1e+30   ;;  %s983_s4 = smov 16   ;;  %vm707_vm7 = vcmask 195584  }
  0x2a   :  { %778 = vmatpush3.msra.mxu0 %v65_v1  ;;  %s984_s5 = smov 24   ;;  %s985_s6 = smov [#allocation9]  }
  0x2b   :  { %779 = vmatprep.subr.mxu0 %v64_v3  ;;  %v173_v25 = vcvt.s32.f32 %v751_v24  ;;  %v174_v27 = vcvt.s32.f32 %v752_v26  ;;  %s718_s7 = sshll.u32 %s985_s6, 4  ;;  %s719_s7 = int_to_ptr.vmem [resolvable:$true] %s718_s7 }
  0x2c   :  { %780 = vmatpush3.msra.mxu0 %v64_v3  ;;  %s944_s8 = scalar_lea.vmem %s719_s7, 256  ;;  %p949_p2 = scmp.lt.s32.totalorder %s719_s7, %s719_s7 }
  0x2d   :  { %781 = vmatprep.subr.mxu0 %v63_v4  ;;  %vm175_vm4 = vcmp.gt.f32.partialorder %v173_v25, 0.5  ;;  %vm176_vm5 = vcmp.gt.f32.partialorder %v174_v27, 0.5  ;;  %p945_p1 = scmp.ne.s32.totalorder %s719_s7, %s944_s8  ;;  %p950_p3 = scmp.lt.s32.totalorder %s944_s8, %s944_s8 }
  0x2e   :  { %782 = vmatpush3.msra.mxu0 %v63_v4  ;;  %v177_v30 = vsel %vm175_vm4, 0.0, %v982_v29  ;;  %v178_v35 = vsel %vm176_vm5, 0.0, %v982_v29 }
  0x2f   :  { %784 = vmatmul.mubr.msk.f32.vlgmr.msra.gmra.mxu0 %vm67_vm0, %v62_v5  ;;  %792 = vmatprep.subr.bf16.mxu0 %v977_v6  ;;  %p951_p4 = por %p950_p3, %p949_p2 }
  0x30   :  { %794 = vmatprep.mubr.msk.bf16.mxu0 %vm978_vm1, %v977_v6 }
  0x31   :  { %p952_p5 = pnand %p951_p4, %p945_p1 }
  0xef   :  { %v785_v7 = vpop.f32.mrf.mxu0 }
  0xf0   :  { %v748_v8 = vpack.c.bf16 %v785_v7, %v785_v7 }
  0xf1   :  { %v140_v9 = vpop.f32.mrf.mxu0 }
  0xf2   :  { %159 = vst.msk [vmem:[#allocation2 + $0x4] sm:$0xf] %vm157_vm2, %v748_v8  ;;  %v747_v10 = vpack.c.bf16 %v140_v9, %v140_v9 }
  0xf4   :  { %158 = vst.msk [vmem:[#allocation2] sm:$0xf] %vm157_vm2, %v747_v10 }
  0xfb   :  { %v850_v11 = vld [vmem:[#allocation2] sm:$0xff]  }
  0xfc   :  { %435 = vrot.lane.b32.xlu1 %v850_v11, %s979_s0  ;;  %312 = vrot.lane.b32.xlu0 %v850_v11, %s980_s2  ;;  %v194_v12 = vsel %vm189_vm3, %v850_v11, 0  ;;  %v851_v13 = vld [vmem:[#allocation2] sm:$0xff]  }
  0xfd   :  { %793 = vmatpush3.bf16.msra.mxu0 %v850_v11  ;;  %787 = vmatpush3.bf16.xpose.msra.mxu1 %v194_v12 }
  0xfe   :  { %798 = vmatprep.subr.bf16.mxu1 %v977_v6  ;;  %804 = vmatprep.subr.bf16.mxu0 %v977_v6 }
 0x100   :  { %433 = vrot.lane.b32.xlu1 %v851_v13, %s979_s0  ;;  %310 = vrot.lane.b32.xlu0 %v851_v13, %s980_s2 }
 0x104   :  { %556 = vrot.lane.b32.xlu1 %v851_v13, %s981_s30  ;;  %558 = vrot.lane.b32.xlu0 %v850_v11, %s981_s30 }
 0x105   :  { %789 = vmatmul.mubr.msk.bf16.vlgmr.msra.gmra.mxu1 %vm189_vm3, %v851_v13 }
 0x106   :  { %800 = vmatprep.mubr.msk.bf16.mxu1 %vm978_vm1, %v977_v6 }
 0x16e   :  { %v1035_v14 = vpop.permute.xlu0 %312  ;;  %v1040_v16 = vpop.permute.xlu1 %435 }
 0x16f   :  { %v318_v15 = vsel %vm189_vm3, %v1035_v14, 0  ;;  %v441_v18 = vsel %vm189_vm3, %v1040_v16, 0 }
 0x170   :  { %799 = vmatpush3.bf16.xpose.msra.mxu1 %v318_v15 }
 0x171   :  { %810 = vmatprep.subr.bf16.mxu1 %v977_v6 }
 0x172   :  { %v311_v17 = vpop.permute.xlu0 %310  ;;  %v434_v20 = vpop.permute.xlu1 %433 }
 0x176   :  { %v1048_v19 = vpop.permute.xlu0 %558  ;;  %v557_v22 = vpop.permute.xlu1 %556 }
 0x177   :  { %801 = vmatmul.mubr.msk.bf16.vlgmr.msra.gmra.mxu1 %vm189_vm3, %v311_v17  ;;  %v564_v21 = vsel %vm189_vm3, %v1048_v19, 0 }
 0x178   :  { %811 = vmatpush3.bf16.xpose.msra.mxu1 %v441_v18  ;;  %812 = vmatprep.mubr.msk.bf16.mxu1 %vm978_vm1, %v977_v6 }
 0x179   :  { %822 = vmatprep.subr.bf16.mxu1 %v977_v6 }
 0x17f   :  { %813 = vmatmul.mubr.msk.bf16.vlgmr.msra.gmra.mxu1 %vm189_vm3, %v434_v20 }
 0x180   :  { %823 = vmatpush3.bf16.xpose.msra.mxu1 %v564_v21  ;;  %824 = vmatprep.mubr.msk.bf16.mxu1 %vm978_vm1, %v977_v6 }
 0x187   :  { %825 = vmatmul.mubr.msk.bf16.vlgmr.msra.gmra.mxu1 %vm189_vm3, %v557_v22 }
 0x1c5   :  { %v230_v28 = vpop.f32.mrf.mxu1 }
 0x1c6   :  { %v237_v31 = vmul.f32 0.35355338, %v230_v28 }
 0x1c7   :  { %v790_v32 = vpop.f32.mrf.mxu1 }
 0x1c8   :  { %v239_v33 = vadd.f32 %v237_v31, %v177_v30 }
 0x1c9   :  { %v233_v34 = vpop.f32.mrf.mxu1 }
 0x1ca   :  { %v238_v36 = vmul.f32 0.35355338, %v233_v34  ;;  %v242_v37 = vsel %vm241_vm6, %v239_v33, -inf }
 0x1cb   :  { %243 = vmax.xlane.f32.xlu0 %v242_v37  ;;  %v791_v38 = vpop.f32.mrf.mxu1 }
 0x1cc   :  { %v240_v39 = vadd.f32 %v238_v36, %v178_v35 }
 0x1ce   :  { %v245_v40 = vsel %vm241_vm6, %v240_v39, -inf }
 0x1cf   :  { %246 = vmax.xlane.f32.xlu1 %v245_v40 }
 0x237   :  { %v354_v41 = vpop.f32.mrf.mxu1 }
 0x238   :  { %v361_v42 = vmul.f32 0.35355338, %v354_v41 }
 0x239   :  { %v802_v43 = vpop.f32.mrf.mxu1 }
 0x23a   :  { %v363_v44 = vadd.f32 %v361_v42, %v177_v30 }
 0x23b   :  { %v357_v45 = vpop.f32.mrf.mxu1 }
 0x23c   :  { %v362_v46 = vmul.f32 0.35355338, %v357_v45  ;;  %v365_v47 = vsel %vm241_vm6, %v363_v44, -inf }
 0x23d   :  { %366 = vmax.xlane.f32.xlu0 %v365_v47  ;;  %v803_v48 = vpop.f32.mrf.mxu1 }
 0x23e   :  { %v364_v49 = vadd.f32 %v362_v46, %v178_v35 }
 0x23f   :  { %v477_v50 = vpop.f32.mrf.mxu1 }
 0x240   :  { %v484_v51 = vmul.f32 0.35355338, %v477_v50  ;;  %v368_v52 = vsel %vm241_vm6, %v364_v49, -inf }
 0x241   :  { %369 = vmax.xlane.f32.xlu0 %v368_v52  ;;  %v814_v53 = vpop.f32.mrf.mxu1 }
 0x242   :  { %v486_v54 = vadd.f32 %v484_v51, %v177_v30 }
 0x243   :  { %v480_v55 = vpop.f32.mrf.mxu1 }
 0x244   :  { %v485_v56 = vmul.f32 0.35355338, %v480_v55  ;;  %v488_v57 = vsel %vm241_vm6, %v486_v54, -inf }
 0x245   :  { %489 = vmax.xlane.f32.xlu1 %v488_v57  ;;  %v815_v58 = vpop.f32.mrf.mxu1 }
 0x246   :  { %v487_v59 = vadd.f32 %v485_v56, %v178_v35 }
 0x247   :  { %v600_v60 = vpop.f32.mrf.mxu1 }
 0x248   :  { %v607_v61 = vmul.f32 0.35355338, %v600_v60  ;;  %v491_v62 = vsel %vm241_vm6, %v487_v59, -inf }
 0x249   :  { %492 = vmax.xlane.f32.xlu0 %v491_v62  ;;  %v826_v63 = vpop.f32.mrf.mxu1 }
 0x24a   :  { %v609_v0 = vadd.f32 %v607_v61, %v177_v30 }
 0x24b   :  { %v603_v1 = vpop.f32.mrf.mxu1 }
 0x24c   :  { %v608_v2 = vmul.f32 0.35355338, %v603_v1  ;;  %v611_v3 = vsel %vm241_vm6, %v609_v0, -inf }
 0x24d   :  { %612 = vmax.xlane.f32.xlu1 %v611_v3  ;;  %v827_v4 = vpop.f32.mrf.mxu1 }
 0x24e   :  { %v610_v5 = vadd.f32 %v608_v2, %v178_v35 }
 0x250   :  { %v614_v7 = vsel %vm241_vm6, %v610_v5, -inf }
 0x251   :  { %615 = vmax.xlane.f32.xlu0 %v614_v7 }
 0x254   :  { %v244_v8 = vpop.xlane.xlu0 %243 }
 0x255   :  { %v248_v9 = vsub.f32 %v239_v33, %v244_v8 }
 0x257   :  { %v250_v10 = vmul.f32 1.442695, %v248_v9 }
 0x258   :  { %v247_v11 = vpop.xlane.xlu1 %246 }
 0x259   :  { %852 = vpow2.f32 %v250_v10  ;;  %v249_v12 = vsub.f32 %v240_v39, %v247_v11 }
 0x25b   :  { %v252_v13 = vmul.f32 1.442695, %v249_v12 }
 0x25d   :  { %854 = vpow2.f32 %v252_v13 }
 0x266   :  { %v853_v15 = vpop.eup %852 }
 0x267   :  { %v254_v17 = vsel %vm241_vm6, %v853_v15, 0.0 }
 0x268   :  { %255 = vadd.xlane.f32.xlu1 %v254_v17 }
 0x26a   :  { %v855_v18 = vpop.eup %854 }
 0x26b   :  { %v257_v20 = vsel %vm241_vm6, %v855_v18, 0.0 }
 0x26c   :  { %258 = vadd.xlane.f32.xlu0 %v257_v20 }
 0x2c6   :  { %v367_v21 = vpop.xlane.xlu0 %366 }
 0x2c7   :  { %v371_v22 = vsub.f32 %v363_v44, %v367_v21 }
 0x2c9   :  { %v373_v23 = vmul.f32 1.442695, %v371_v22 }
 0x2ca   :  { %v370_v24 = vpop.xlane.xlu0 %369 }
 0x2cb   :  { %856 = vpow2.f32 %v373_v23  ;;  %v372_v25 = vsub.f32 %v364_v49, %v370_v24 }
 0x2cd   :  { %v375_v26 = vmul.f32 1.442695, %v372_v25 }
 0x2ce   :  { %v490_v27 = vpop.xlane.xlu1 %489 }
 0x2cf   :  { %858 = vpow2.f32 %v375_v26  ;;  %v494_v28 = vsub.f32 %v486_v54, %v490_v27 }
 0x2d1   :  { %v496_v29 = vmul.f32 1.442695, %v494_v28 }
 0x2d2   :  { %v493_v30 = vpop.xlane.xlu0 %492 }
 0x2d3   :  { %860 = vpow2.f32 %v496_v29  ;;  %v495_v31 = vsub.f32 %v487_v59, %v493_v30 }
 0x2d5   :  { %v498_v32 = vmul.f32 1.442695, %v495_v31 }
 0x2d6   :  { %v613_v33 = vpop.xlane.xlu1 %612 }
 0x2d7   :  { %862 = vpow2.f32 %v498_v32  ;;  %v617_v34 = vsub.f32 %v609_v0, %v613_v33 }
 0x2d8   :  { %v857_v35 = vpop.eup %856 }
 0x2d9   :  { %v619_v36 = vmul.f32 1.442695, %v617_v34  ;;  %v377_v37 = vsel %vm241_vm6, %v857_v35, 0.0 }
 0x2da   :  { %378 = vadd.xlane.f32.xlu1 %v377_v37  ;;  %v616_v38 = vpop.xlane.xlu0 %615 }
 0x2db   :  { %864 = vpow2.f32 %v619_v36  ;;  %v618_v39 = vsub.f32 %v610_v5, %v616_v38 }
 0x2dc   :  { %v859_v40 = vpop.eup %858 }
 0x2dd   :  { %v621_v41 = vmul.f32 1.442695, %v618_v39  ;;  %v380_v42 = vsel %vm241_vm6, %v859_v40, 0.0 }
 0x2de   :  { %381 = vadd.xlane.f32.xlu0 %v380_v42 }
 0x2df   :  { %866 = vpow2.f32 %v621_v41 }
 0x2e0   :  { %v861_v43 = vpop.eup %860 }
 0x2e1   :  { %v500_v44 = vsel %vm241_vm6, %v861_v43, 0.0 }
 0x2e2   :  { %501 = vadd.xlane.f32.xlu1 %v500_v44 }
 0x2e4   :  { %v863_v45 = vpop.eup %862 }
 0x2e5   :  { %v503_v46 = vsel %vm241_vm6, %v863_v45, 0.0 }
 0x2e6   :  { %504 = vadd.xlane.f32.xlu0 %v503_v46 }
 0x2e8   :  { %v865_v47 = vpop.eup %864 }
 0x2e9   :  { %v623_v48 = vsel %vm241_vm6, %v865_v47, 0.0 }
 0x2ea   :  { %624 = vadd.xlane.f32.xlu1 %v623_v48 }
 0x2ec   :  { %v867_v49 = vpop.eup %866 }
 0x2ed   :  { %v626_v50 = vsel %vm241_vm6, %v867_v49, 0.0 }
 0x2ee   :  { %627 = vadd.xlane.f32.xlu0 %v626_v50 }
 0x2f1   :  { %v256_v51 = vpop.xlane.xlu1 %255 }
 0x2f2   :  { %868 = vrcp.f32 %v256_v51 }
 0x2f5   :  { %v259_v52 = vpop.xlane.xlu0 %258 }
 0x2f6   :  { %870 = vrcp.f32 %v259_v52 }
 0x2ff   :  { %v869_v53 = vpop.eup %868 }
 0x300   :  { %v262_v55 = vmul.f32 %v869_v53, %v853_v15 }
 0x303   :  { %v871_v54 = vpop.eup %870 }
 0x304   :  { %v263_v56 = vmul.f32 %v871_v54, %v855_v18 }
 0x306   :  { %v264_v57 = vpack.c.bf16 %v263_v56, %v262_v55 }
 0x308   :  { %795 = vmatmul.mubr.msk.bf16.vlgmr.msra.gmra.mxu0 %vm241_vm6, %v264_v57 }
 0x309   :  { %805 = vmatpush3.bf16.msra.mxu0 %v1035_v14  ;;  %806 = vmatprep.mubr.msk.bf16.mxu0 %vm978_vm1, %v977_v6 }
 0x30a   :  { %816 = vmatprep.subr.bf16.mxu0 %v977_v6 }
 0x363   :  { %v379_v58 = vpop.xlane.xlu1 %378 }
 0x364   :  { %872 = vrcp.f32 %v379_v58 }
 0x367   :  { %v382_v59 = vpop.xlane.xlu0 %381 }
 0x368   :  { %874 = vrcp.f32 %v382_v59 }
 0x36b   :  { %v502_v60 = vpop.xlane.xlu1 %501 }
 0x36c   :  { %876 = vrcp.f32 %v502_v60 }
 0x36f   :  { %v505_v61 = vpop.xlane.xlu0 %504 }
 0x370   :  { %878 = vrcp.f32 %v505_v61 }
 0x371   :  { %v873_v62 = vpop.eup %872 }
 0x372   :  { %v385_v1 = vmul.f32 %v873_v62, %v857_v35 }
 0x373   :  { %v625_v63 = vpop.xlane.xlu1 %624 }
 0x374   :  { %880 = vrcp.f32 %v625_v63 }
 0x375   :  { %v875_v0 = vpop.eup %874 }
 0x376   :  { %v386_v2 = vmul.f32 %v875_v0, %v859_v40 }
 0x377   :  { %v628_v14 = vpop.xlane.xlu0 %627 }
 0x378   :  { %882 = vrcp.f32 %v628_v14  ;;  %v387_v3 = vpack.c.bf16 %v386_v2, %v385_v1 }
 0x379   :  { %v877_v4 = vpop.eup %876 }
 0x37a   :  { %807 = vmatmul.mubr.msk.bf16.vlgmr.msra.gmra.mxu0 %vm241_vm6, %v387_v3  ;;  %v508_v7 = vmul.f32 %v877_v4, %v861_v43 }
 0x37b   :  { %817 = vmatpush3.bf16.msra.mxu0 %v1040_v16  ;;  %818 = vmatprep.mubr.msk.bf16.mxu0 %vm978_vm1, %v977_v6 }
 0x37c   :  { %828 = vmatprep.subr.bf16.mxu0 %v977_v6 }
 0x37d   :  { %v879_v5 = vpop.eup %878 }
 0x37e   :  { %v509_v8 = vmul.f32 %v879_v5, %v863_v45 }
 0x380   :  { %v510_v9 = vpack.c.bf16 %v509_v8, %v508_v7 }
 0x381   :  { %v881_v10 = vpop.eup %880 }
 0x382   :  { %819 = vmatmul.mubr.msk.bf16.vlgmr.msra.gmra.mxu0 %vm241_vm6, %v510_v9  ;;  %v631_v12 = vmul.f32 %v881_v10, %v865_v47 }
 0x383   :  { %829 = vmatpush3.bf16.msra.mxu0 %v1048_v19  ;;  %830 = vmatprep.mubr.msk.bf16.mxu0 %vm978_vm1, %v977_v6 }
 0x385   :  { %v883_v11 = vpop.eup %882 }
 0x386   :  { %v632_v16 = vmul.f32 %v883_v11, %v867_v49 }
 0x388   :  { %v633_v13 = vpack.c.bf16 %v632_v16, %v631_v12 }
 0x38a   :  { %831 = vmatmul.mubr.msk.bf16.vlgmr.msra.gmra.mxu0 %vm241_vm6, %v633_v13 }
 0x3c8   :  { %v303_v15 = vpop.f32.mrf.mxu0 }
 0x3ca   :  { %v796_v17 = vpop.f32.mrf.mxu0 }
 0x3cc   :  { %v306_v18 = vpop.f32.mrf.mxu0 }
 0x3ce   :  { %v797_v20 = vpop.f32.mrf.mxu0 }
 0x43a   :  { %v426_v21 = vpop.f32.mrf.mxu0 }
 0x43b   :  { %681 = vrot.lane.b32.xlu1 %v426_v21, %s973_s18 }
 0x43c   :  { %v808_v22 = vpop.f32.mrf.mxu0 }
 0x43e   :  { %v429_v23 = vpop.f32.mrf.mxu0 }
 0x43f   :  { %683 = vrot.lane.b32.xlu0 %v429_v23, %s973_s18 }
 0x440   :  { %v809_v19 = vpop.f32.mrf.mxu0 }
 0x442   :  { %v549_v24 = vpop.f32.mrf.mxu0 }
 0x443   :  { %689 = vrot.lane.b32.xlu1 %v549_v24, %s983_s4 }
 0x444   :  { %v820_v6 = vpop.f32.mrf.mxu0 }
 0x446   :  { %v552_v25 = vpop.f32.mrf.mxu0 }
 0x447   :  { %691 = vrot.lane.b32.xlu1 %v552_v25, %s983_s4 }
 0x448   :  { %v821_v26 = vpop.f32.mrf.mxu0 }
 0x44a   :  { %v672_v27 = vpop.f32.mrf.mxu0 }
 0x44b   :  { %697 = vrot.lane.b32.xlu0 %v672_v27, %s984_s5 }
 0x44c   :  { %v832_v28 = vpop.f32.mrf.mxu0 }
 0x44e   :  { %v675_v29 = vpop.f32.mrf.mxu0 }
 0x44f   :  { %699 = vrot.lane.b32.xlu1 %v675_v29, %s984_s5 }
 0x450   :  { %v833_v30 = vpop.f32.mrf.mxu0 }
 0x4ad   :  { %v682_v31 = vpop.permute.xlu1 %681 }
 0x4ae   :  { %v703_v34 = vsel %vm189_vm3, %v303_v15, %v682_v31 }
 0x4b1   :  { %v684_v33 = vpop.permute.xlu0 %683 }
 0x4b2   :  { %v704_v39 = vsel %vm189_vm3, %v306_v18, %v684_v33 }
 0x4b5   :  { %v690_v32 = vpop.permute.xlu1 %689 }
 0x4b6   :  { %v705_v35 = vsel %vm241_vm6, %v703_v34, %v690_v32 }
 0x4b9   :  { %v692_v36 = vpop.permute.xlu1 %691 }
 0x4ba   :  { %v706_v40 = vsel %vm241_vm6, %v704_v39, %v692_v36 }
 0x4bd   :  { %v698_v37 = vpop.permute.xlu0 %697 }
 0x4be   :  { %v708_v38 = vsel %vm707_vm7, %v705_v35, %v698_v37 }
 0x4bf   :  { %711 = vst.msk [vmem:[#allocation9] sm:$0xff] %vm67_vm0, %v708_v38 }
 0x4c1   :  { %v700_v41 = vpop.permute.xlu1 %699 }
 0x4c2   :  { %v709_v42 = vsel %vm707_vm7, %v706_v40, %v700_v41 }
 0x4c3   :  { %712 = vst.msk [vmem:[#allocation9 + $0x8] sm:$0xff] %vm67_vm0, %v709_v42 }
 0x4c4   :  { %955 = shalt.err (!%p952_p5)
}
 0x4c5   :  { %724 = dma.vmem_to_hbm [thread:$0]  %s719_s7, 256, %s1104_s3, [#allocation5], %s972_s17, %s972_s17, %s973_s18  }
 0x4c6   :  { %968 = dma.done.wait [#allocation5], 256  }
 0x4c7   :  { %969 = vsyncadd [#allocation5], 4294967040 }
 0x4c8   :  { %728 = vsyncpa [#allocation4], 1 }
 0x4c9   :  { %729 = vsyncpa [#allocation7], 1 }
 0x4ca   :  { %730 = vsyncpa [#allocation5], 1 }

</bundles_post_ra>
